<compile_context>
chip_gen: v7x
topology: tpu7x:2x2x1
jax: 0.10.0
libtpu: 0.0.40
codegen_flags: <defaults>
</compile_context>

<pallas_src>
import functools
import math

import jax
import jax.numpy as jnp
from jax import lax
from jax.experimental import pallas as pl
from jax.experimental.pallas import tpu as pltpu


_LEAKY_SLOPE = 0.2
_IN_EPS = 1e-5


def _row_tile(H, W, cout):
    """Rows per conv matmul tile: keep the f32 accumulator around ~64 KB."""
    wp = W + 2
    budget_rows = max(wp, (64 * 1024) // (4 * max(int(cout), 1)))
    rt = max(1, min(H, budget_rows // wp))
    rt = 1 << (rt.bit_length() - 1)          # power of two (H is a power of two)
    while rt > 1 and H % rt != 0:
        rt //= 2
    return rt


def _compiler_params():
    return pltpu.CompilerParams(dimension_semantics=("parallel",))


# ----------------------------------------------------------------------------
# In-kernel helpers (traced inside the Pallas kernels; all 2-D ops)
# ----------------------------------------------------------------------------
def _pad_input(xp_ref, x_ref, H, W):
    """Write x (H*W, Cin) into the flat zero-padded buffer (rows = (H+2)*(W+2))."""
    Wp = W + 2
    xp_ref[...] = jnp.zeros(xp_ref.shape, xp_ref.dtype)
    for h in range(H):
        xp_ref[pl.ds((h + 1) * Wp + 1, W), :] = x_ref[pl.ds(h * W, W), :]


def _conv3x3_tile(xp_ref, w_ref, acc_ref, r0, row_tile, Wp):
    """Accumulate 9 MXU matmuls for output rows [r0, r0+row_tile) into acc_ref.

    Tap (dh, dw) contributes xp rows starting at (r0+dh)*Wp + dw: the dw shift
    is absorbed into the slab start, so every tap writes the *same* full
    accumulator slab.  Wrap-around rows only touch the scratch columns
    (w >= W), which are dropped at compaction time.
    """
    m = row_tile * Wp
    for idx in range(9):
        dh, dw = divmod(idx, 3)
        part = jnp.dot(xp_ref[pl.ds((r0 + dh) * Wp + dw, m), :], w_ref[idx],
                       preferred_element_type=jnp.float32)
        if idx == 0:
            acc_ref[...] = part
        else:
            acc_ref[...] += part


def _noise_act_in_adain(y, nw, noise, gamma, beta):
    """NoiseFusion + LeakyReLU(0.2) + InstanceNorm2d + AdaIN affine (f32)."""
    y = y + nw * noise                                   # (HW,C)+(1,C)*(HW,1)
    y = jnp.where(y >= 0.0, y, _LEAKY_SLOPE * y)
    mean = jnp.mean(y, axis=0, keepdims=True)
    var = jnp.mean(jnp.square(y - mean), axis=0, keepdims=True)
    y = (y - mean) * lax.rsqrt(var + _IN_EPS)
    return gamma * y + beta


# ----------------------------------------------------------------------------
# Pallas kernels
# ----------------------------------------------------------------------------
def conv3x3_kernel(x_ref, w_ref, b_ref, o_ref, xp_ref, acc_ref, *, H, W, row_tile):
    # ScaledConv2d(k=3, s=1, p=1) only (the Upsample block's conv).
    Wp = W + 2
    _pad_input(xp_ref, x_ref, H, W)
    bias = b_ref[...]                                    # (1, Cout) f32
    for t in range(H // row_tile):
        r0 = t * row_tile
        _conv3x3_tile(xp_ref, w_ref, acc_ref, r0, row_tile, Wp)
        for hh in range(row_tile):                       # drop the 2 scratch cols
            o_ref[pl.ds((r0 + hh) * W, W), :] = (
                acc_ref[pl.ds(hh * Wp, W), :] + bias).astype(o_ref.dtype)


def fused_layer_kernel(x_ref, w_ref, b_ref, nw_ref, ga_ref, be_ref, n_ref, o_ref,
                       xp_ref, acc_ref, cmp_ref, *, H, W, row_tile):
    # ScaledConv2d -> NoiseFusion -> LeakyReLU(0.2) -> InstanceNorm -> AdaIN.
    Wp = W + 2
    _pad_input(xp_ref, x_ref, H, W)
    for t in range(H // row_tile):
        r0 = t * row_tile
        _conv3x3_tile(xp_ref, w_ref, acc_ref, r0, row_tile, Wp)
        for hh in range(row_tile):                       # compact Wp-strided rows
            cmp_ref[pl.ds((r0 + hh) * W, W), :] = acc_ref[pl.ds(hh * Wp, W), :]
    y = cmp_ref[...] + b_ref[...]                        # (H*W, Cout) f32
    out = _noise_act_in_adain(y, nw_ref[...], n_ref[...], ga_ref[...], be_ref[...])
    o_ref[...] = out.astype(o_ref.dtype)


def noise_adain_kernel(x_ref, nw_ref, ga_ref, be_ref, n_ref, o_ref):
    # Epilogue only (init stage operates directly on the learned constant).
    y = x_ref[...].astype(jnp.float32)
    out = _noise_act_in_adain(y, nw_ref[...], n_ref[...], ga_ref[...], be_ref[...])
    o_ref[...] = out.astype(o_ref.dtype)


# ----------------------------------------------------------------------------
# Kernel wrappers (host side: free NHWC <-> (B, H*W, C) reshapes)
# ----------------------------------------------------------------------------
def conv3x3(x, w, b):
    """ScaledConv2d(k=3, s=1, p=1). x: (B,H,W,Cin) bf16 -> (B,H,W,Cout) bf16."""
    B, H, W, Cin = x.shape
    Cout = w.shape[-1]
    Wp = W + 2
    rt = _row_tile(H, W, Cout)
    xf = x.reshape(B, H * W, Cin)
    out = pl.pallas_call(
        functools.partial(conv3x3_kernel, H=H, W=W, row_tile=rt),
        out_shape=jax.ShapeDtypeStruct((B, H * W, Cout), x.dtype),
        grid=(B,),
        in_specs=[
            pl.BlockSpec((None, H * W, Cin), lambda bb: (bb, 0, 0)),
            pl.BlockSpec((9, Cin, Cout), lambda bb: (0, 0, 0)),
            pl.BlockSpec((1, Cout), lambda bb: (0, 0)),
        ],
        out_specs=pl.BlockSpec((None, H * W, Cout), lambda bb: (bb, 0, 0)),
        scratch_shapes=[
            pltpu.VMEM(((H + 2) * Wp + 8, Cin), x.dtype),       # padded input
            pltpu.VMEM((rt * Wp, Cout), jnp.float32),           # f32 accumulator
        ],
        compiler_params=_compiler_params(),
    )(xf, w, b)
    return out.reshape(B, H, W, Cout)


def fused_conv_layer(x, w, b, noise_w, gamma, beta, noise):
    """conv3x3 + bias + noise + LeakyReLU + InstanceNorm + AdaIN (one kernel)."""
    B, H, W, Cin = x.shape
    Cout = w.shape[-1]
    Wp = W + 2
    rt = _row_tile(H, W, Cout)
    xf = x.reshape(B, H * W, Cin)
    out = pl.pallas_call(
        functools.partial(fused_layer_kernel, H=H, W=W, row_tile=rt),
        out_shape=jax.ShapeDtypeStruct((B, H * W, Cout), x.dtype),
        grid=(B,),
        in_specs=[
            pl.BlockSpec((None, H * W, Cin), lambda bb: (bb, 0, 0)),
            pl.BlockSpec((9, Cin, Cout), lambda bb: (0, 0, 0)),
            pl.BlockSpec((1, Cout), lambda bb: (0, 0)),
            pl.BlockSpec((1, Cout), lambda bb: (0, 0)),
            pl.BlockSpec((None, 1, Cout), lambda bb: (bb, 0, 0)),
            pl.BlockSpec((None, 1, Cout), lambda bb: (bb, 0, 0)),
            pl.BlockSpec((None, H * W, 1), lambda bb: (bb, 0, 0)),
        ],
        out_specs=pl.BlockSpec((None, H * W, Cout), lambda bb: (bb, 0, 0)),
        scratch_shapes=[
            pltpu.VMEM(((H + 2) * Wp + 8, Cin), x.dtype),       # padded input
            pltpu.VMEM((rt * Wp, Cout), jnp.float32),           # f32 accumulator
            pltpu.VMEM((H * W, Cout), jnp.float32),             # compacted conv out
        ],
        compiler_params=_compiler_params(),
    )(xf, w, b, noise_w, gamma, beta, noise)
    return out.reshape(B, H, W, Cout)


def noise_adain(x, noise_w, gamma, beta, noise):
    """NoiseFusion -> LeakyReLU(0.2) -> AdaptiveInstanceNorm (init stage)."""
    B, H, W, C = x.shape
    xf = x.reshape(B, H * W, C)
    out = pl.pallas_call(
        noise_adain_kernel,
        out_shape=jax.ShapeDtypeStruct((B, H * W, C), x.dtype),
        grid=(B,),
        in_specs=[
            pl.BlockSpec((None, H * W, C), lambda bb: (bb, 0, 0)),
            pl.BlockSpec((1, C), lambda bb: (0, 0)),
            pl.BlockSpec((None, 1, C), lambda bb: (bb, 0, 0)),
            pl.BlockSpec((None, 1, C), lambda bb: (bb, 0, 0)),
            pl.BlockSpec((None, H * W, 1), lambda bb: (bb, 0, 0)),
        ],
        out_specs=pl.BlockSpec((None, H * W, C), lambda bb: (bb, 0, 0)),
        compiler_params=_compiler_params(),
    )(xf, noise_w, gamma, beta, noise)
    return out.reshape(B, H, W, C)


# ----------------------------------------------------------------------------
# Parameter construction (mirrors the torch module __init__)
# ----------------------------------------------------------------------------
def scaled_conv_params(key, cin, cout):
    # ScaledConv2d (equalized lr): raw weight ~ N(0,1), scale sqrt(2/fan_in).
    w = jax.random.normal(key, (3, 3, cin, cout), jnp.float32)
    w = (w * math.sqrt(2.0 / (cin * 9))).reshape(9, cin, cout)
    return (w.astype(jnp.bfloat16), jnp.zeros((1, cout), jnp.float32))


def adain_params(key, c, style_dim):
    # ScaledLinear(style_dim -> 2C); gamma-bias initialized to 1, beta-bias 0.
    w = jax.random.normal(key, (style_dim, 2 * c), jnp.float32)
    w = w * math.sqrt(2.0 / style_dim)
    b = jnp.concatenate([jnp.ones((1, c), jnp.float32),
                         jnp.zeros((1, c), jnp.float32)], axis=1)
    return (w, b)


def init_synthesizer_params(key, in_channel, style_dim, img_size,
                            max_channel=512):
    num_blocks = int(math.log2(img_size)) - 2
    mid_channels = list(reversed(
        [min(2 ** i, max_channel) for i in range(4, num_blocks + 4)]
        + [in_channel]))

    keys = iter(jax.random.split(key, 4 + 5 * num_blocks))
    params = {
        "constant": jnp.ones((1, 4, 4, in_channel), jnp.bfloat16),   # NHWC
        "init_noise_1": jnp.zeros((1, in_channel), jnp.float32),     # torch zeros
        "init_norm_1": adain_params(next(keys), in_channel, style_dim),
        "init_conv_2": scaled_conv_params(next(keys), in_channel, in_channel),
        "init_noise_2": jnp.zeros((1, in_channel), jnp.float32),
        "init_norm_2": adain_params(next(keys), in_channel, style_dim),
        "blocks": [],
        "mid_channels": mid_channels,
    }
    for i in range(num_blocks):
        cin, cout = mid_channels[i], mid_channels[i + 1]
        params["blocks"].append({
            "up_conv": scaled_conv_params(next(keys), cin, cin),
            "conv1": scaled_conv_params(next(keys), cin, cout),
            "noise1": jnp.zeros((1, cout), jnp.float32),
            "norm1": adain_params(next(keys), cout, style_dim),
            "conv2": scaled_conv_params(next(keys), cout, cout),
            "noise2": jnp.zeros((1, cout), jnp.float32),
            "norm2": adain_params(next(keys), cout, style_dim),
        })
    return params


# ----------------------------------------------------------------------------
# Full forward pass (Synthesizer.forward)
# ----------------------------------------------------------------------------
def _adain_gamma_beta(style_vec, lin_w, lin_b):
    # Hoisted AdaIN affine: one tiny (B,S)@(S,2C) matmul on the host (glue).
    gb = style_vec.astype(jnp.float32) @ lin_w + lin_b            # (B, 2C)
    c = gb.shape[-1] // 2
    return gb[:, None, :c], gb[:, None, c:]                       # (B,1,C) each


def _nearest_up2(x):
    # Nearest-neighbor 2x upsample (host glue; see TODO(synk) at top of file).
    return jnp.repeat(jnp.repeat(x, 2, axis=1), 2, axis=2)


def synthesizer_forward(params, style, noise_key):
    # style: (B, 2 + 2*num_blocks, style_dim)
    B = style.shape[0]
    blocks = params["blocks"]
    nkeys = jax.random.split(noise_key, 2 + 2 * len(blocks))
    ki = 0

    const = params["constant"]
    x = jnp.broadcast_to(const, (B,) + const.shape[1:])
    H = W = 4

    # ---- init stage (4x4) ----
    noise = jax.random.normal(nkeys[ki], (B, H * W, 1), jnp.float32); ki += 1
    ga, be = _adain_gamma_beta(style[:, 0], *params["init_norm_1"])
    x = noise_adain(x, params["init_noise_1"], ga, be, noise)

    noise = jax.random.normal(nkeys[ki], (B, H * W, 1), jnp.float32); ki += 1
    ga, be = _adain_gamma_beta(style[:, 1], *params["init_norm_2"])
    x = fused_conv_layer(x, *params["init_conv_2"],
                         params["init_noise_2"], ga, be, noise)

    # ---- upsampling synthesizer blocks ----
    for idx, blk in enumerate(blocks):
        x = _nearest_up2(x)
        x = conv3x3(x, *blk["up_conv"])
        _, H, W, _ = x.shape

        noise = jax.random.normal(nkeys[ki], (B, H * W, 1), jnp.float32); ki += 1
        ga, be = _adain_gamma_beta(style[:, (idx + 1) * 2], *blk["norm1"])
        x = fused_conv_layer(x, *blk["conv1"], blk["noise1"], ga, be, noise)

        noise = jax.random.normal(nkeys[ki], (B, H * W, 1), jnp.float32); ki += 1
        ga, be = _adain_gamma_beta(style[:, (idx + 1) * 2 + 1], *blk["norm2"])
        x = fused_conv_layer(x, *blk["conv2"], blk["noise2"], ga, be, noise)
    return x


# ----------------------------------------------------------------------------
if __name__ == "__main__":
    # Small config: in_channel=32, style_dim=32, img_size=16 -> 2 blocks,
    # mid_channels = [32, 32, 16], styles needed = 2 + 2*2 = 6.
    B, IN_CH, STYLE_DIM, IMG_SIZE = 2, 32, 32, 16
    num_blocks = int(math.log2(IMG_SIZE)) - 2
    num_styles = 2 + 2 * num_blocks

    root = jax.random.PRNGKey(0)
    k_param, k_style, k_noise = jax.random.split(root, 3)

    params = init_synthesizer_params(k_param, IN_CH, STYLE_DIM, IMG_SIZE)
    style = jax.random.normal(k_style, (B, num_styles, STYLE_DIM), jnp.float32)

    out = synthesizer_forward(params, style, k_noise)
    out = jax.block_until_ready(out)

    assert out.shape == (B, IMG_SIZE, IMG_SIZE, params["mid_channels"][-1]), out.shape
    assert bool(jnp.all(jnp.isfinite(out.astype(jnp.float32))))
    print("KERNEL_OK")
</pallas_src>

<mosaic_0001>
module attributes {stable_mosaic.version = 11 : i64} {
  func.func @noise_adain_kernel(%arg0: i32, %arg1: memref<1x16x32xbf16, #tpu.memory_space<vmem>>, %arg2: memref<1x32xf32, #tpu.memory_space<vmem>>, %arg3: memref<1x1x32xf32, #tpu.memory_space<vmem>>, %arg4: memref<1x1x32xf32, #tpu.memory_space<vmem>>, %arg5: memref<1x16x1xf32, #tpu.memory_space<vmem>>, %arg6: memref<1x16x32xbf16, #tpu.memory_space<vmem>>) attributes {dimension_semantics = [#tpu.dimension_semantics<parallel>], iteration_bounds = array<i64: 2>, scalar_prefetch = 0 : i64, scratch_operands = 0 : i64, tpu.core_type = #tpu.core_type<tc>, window_params = [{transform_indices = @transform_0, window_bounds = array<i64: 1, 16, 32>}, {pipeline_mode = #tpu.pipeline_mode<synchronous>, transform_indices = @transform_1, window_bounds = array<i64: 1, 32>}, {transform_indices = @transform_2, window_bounds = array<i64: 1, 1, 32>}, {transform_indices = @transform_3, window_bounds = array<i64: 1, 1, 32>}, {transform_indices = @transform_4, window_bounds = array<i64: 1, 16, 1>}, {transform_indices = @transform_5, window_bounds = array<i64: 1, 16, 32>}]} {
    %c0 = arith.constant 0 : index
    %c0_0 = arith.constant 0 : index
    %c0_1 = arith.constant 0 : index
    %0 = vector.load %arg1[%c0, %c0_0, %c0_1] : memref<1x16x32xbf16, #tpu.memory_space<vmem>>, vector<1x16x32xbf16>
    %1 = vector.shape_cast %0 : vector<1x16x32xbf16> to vector<16x32xbf16>
    %2 = arith.extf %1 : vector<16x32xbf16> to vector<16x32xf32>
    %c0_2 = arith.constant 0 : index
    %c0_3 = arith.constant 0 : index
    %3 = vector.load %arg2[%c0_2, %c0_3] : memref<1x32xf32, #tpu.memory_space<vmem>>, vector<1x32xf32>
    %c0_4 = arith.constant 0 : index
    %c0_5 = arith.constant 0 : index
    %c0_6 = arith.constant 0 : index
    %4 = vector.load %arg5[%c0_4, %c0_5, %c0_6] : memref<1x16x1xf32, #tpu.memory_space<vmem>>, vector<1x16x1xf32>
    %5 = vector.shape_cast %4 : vector<1x16x1xf32> to vector<16x1xf32>
    %c0_7 = arith.constant 0 : index
    %c0_8 = arith.constant 0 : index
    %c0_9 = arith.constant 0 : index
    %6 = vector.load %arg3[%c0_7, %c0_8, %c0_9] : memref<1x1x32xf32, #tpu.memory_space<vmem>>, vector<1x1x32xf32>
    %7 = vector.shape_cast %6 : vector<1x1x32xf32> to vector<1x32xf32>
    %c0_10 = arith.constant 0 : index
    %c0_11 = arith.constant 0 : index
    %c0_12 = arith.constant 0 : index
    %8 = vector.load %arg4[%c0_10, %c0_11, %c0_12] : memref<1x1x32xf32, #tpu.memory_space<vmem>>, vector<1x1x32xf32>
    %9 = vector.shape_cast %8 : vector<1x1x32xf32> to vector<1x32xf32>
    %10 = vector.broadcast %3 : vector<1x32xf32> to vector<16x32xf32>
    %11 = vector.broadcast %5 : vector<16x1xf32> to vector<16x32xf32>
    %12 = arith.mulf %10, %11 : vector<16x32xf32>
    %13 = arith.addf %2, %12 : vector<16x32xf32>
    %cst = arith.constant 0.000000e+00 : f32
    %14 = vector.broadcast %cst : f32 to vector<16x32xf32>
    %15 = arith.cmpf oge, %13, %14 : vector<16x32xf32>
    %cst_13 = arith.constant 2.000000e-01 : f32
    %16 = vector.broadcast %cst_13 : f32 to vector<16x32xf32>
    %17 = arith.mulf %16, %13 : vector<16x32xf32>
    %18 = arith.select %15, %13, %17 : vector<16x32xi1>, vector<16x32xf32>
    %cst_14 = arith.constant dense<0.000000e+00> : vector<32xf32>
    %19 = vector.multi_reduction <add>, %18, %cst_14 [0] : vector<16x32xf32> to vector<32xf32>
    %20 = vector.shape_cast %19 : vector<32xf32> to vector<1x32xf32>
    %cst_15 = arith.constant 1.600000e+01 : f32
    %21 = vector.broadcast %cst_15 : f32 to vector<1x32xf32>
    %22 = arith.divf %20, %21 : vector<1x32xf32>
    %23 = vector.broadcast %22 : vector<1x32xf32> to vector<16x32xf32>
    %24 = arith.subf %18, %23 : vector<16x32xf32>
    %25 = arith.mulf %24, %24 : vector<16x32xf32>
    %cst_16 = arith.constant dense<0.000000e+00> : vector<32xf32>
    %26 = vector.multi_reduction <add>, %25, %cst_16 [0] : vector<16x32xf32> to vector<32xf32>
    %27 = vector.shape_cast %26 : vector<32xf32> to vector<1x32xf32>
    %cst_17 = arith.constant 1.600000e+01 : f32
    %28 = vector.broadcast %cst_17 : f32 to vector<1x32xf32>
    %29 = arith.divf %27, %28 : vector<1x32xf32>
    %30 = vector.broadcast %22 : vector<1x32xf32> to vector<16x32xf32>
    %31 = arith.subf %18, %30 : vector<16x32xf32>
    %cst_18 = arith.constant 9.99999974E-6 : f32
    %32 = vector.broadcast %cst_18 : f32 to vector<1x32xf32>
    %33 = arith.addf %29, %32 : vector<1x32xf32>
    %34 = math.rsqrt %33 : vector<1x32xf32>
    %35 = vector.broadcast %34 : vector<1x32xf32> to vector<16x32xf32>
    %36 = arith.mulf %31, %35 : vector<16x32xf32>
    %37 = vector.broadcast %7 : vector<1x32xf32> to vector<16x32xf32>
    %38 = arith.mulf %37, %36 : vector<16x32xf32>
    %39 = vector.broadcast %9 : vector<1x32xf32> to vector<16x32xf32>
    %40 = arith.addf %38, %39 : vector<16x32xf32>
    %41 = arith.truncf %40 : vector<16x32xf32> to vector<16x32xbf16>
    %c0_19 = arith.constant 0 : index
    %c0_20 = arith.constant 0 : index
    %c0_21 = arith.constant 0 : index
    %42 = vector.load %arg6[%c0_19, %c0_20, %c0_21] : memref<1x16x32xbf16, #tpu.memory_space<vmem>>, vector<1x16x32xbf16>
    %43 = vector.shape_cast %42 : vector<1x16x32xbf16> to vector<16x32xbf16>
    %44 = vector.shape_cast %41 : vector<16x32xbf16> to vector<1x16x32xbf16>
    tpu.vector_store %arg6[%c0_19, %c0_20, %c0_21], %44 {strides = array<i32>} : memref<1x16x32xbf16, #tpu.memory_space<vmem>>, vector<1x16x32xbf16>,
    return
  }
  func.func @transform_0(%arg0: i32) -> (i32, i32, i32) {
    %c0_i32 = arith.constant 0 : i32
    %c0_i32_0 = arith.constant 0 : i32
    %c0_i32_1 = arith.constant 0 : i32
    return %arg0, %c0_i32, %c0_i32_0 : i32, i32, i32
  }
  func.func @transform_1(%arg0: i32) -> (i32, i32) {
    %c0_i32 = arith.constant 0 : i32
    %c0_i32_0 = arith.constant 0 : i32
    %c0_i32_1 = arith.constant 0 : i32
    return %c0_i32, %c0_i32_0 : i32, i32
  }
  func.func @transform_2(%arg0: i32) -> (i32, i32, i32) {
    %c0_i32 = arith.constant 0 : i32
    %c0_i32_0 = arith.constant 0 : i32
    %c0_i32_1 = arith.constant 0 : i32
    return %arg0, %c0_i32, %c0_i32_0 : i32, i32, i32
  }
  func.func @transform_3(%arg0: i32) -> (i32, i32, i32) {
    %c0_i32 = arith.constant 0 : i32
    %c0_i32_0 = arith.constant 0 : i32
    %c0_i32_1 = arith.constant 0 : i32
    return %arg0, %c0_i32, %c0_i32_0 : i32, i32, i32
  }
  func.func @transform_4(%arg0: i32) -> (i32, i32, i32) {
    %c0_i32 = arith.constant 0 : i32
    %c0_i32_0 = arith.constant 0 : i32
    %c0_i32_1 = arith.constant 0 : i32
    return %arg0, %c0_i32, %c0_i32_0 : i32, i32, i32
  }
  func.func @transform_5(%arg0: i32) -> (i32, i32, i32) {
    %c0_i32 = arith.constant 0 : i32
    %c0_i32_0 = arith.constant 0 : i32
    %c0_i32_1 = arith.constant 0 : i32
    return %arg0, %c0_i32, %c0_i32_0 : i32, i32, i32
  }
}

</mosaic_0001>

<bundles_post_ra>
// kernel: tpu_custom_call.1
= control target key start
LH: loop header
LB: loop body
LE: loop exit
PB: predicated region body
PF: predicated region fallthrough
CT: control target
= control target key end

     0   :  { %10 = vsyncpa [#allocation3], 0  ;;  %s765_s0 = inlined_call_operand.vmem [shape: bf16[2,16,32], index: 0, kind: input, shape index: {}]   ;;  %s766_s1 = inlined_call_operand.vmem [shape: f32[1,32], index: 1, kind: input, shape index: {}]   ;;  %s767_s2 = inlined_call_operand.vmem [shape: f32[2,1,32], index: 2, kind: input, shape index: {}]   ;;  %s768_s3 = inlined_call_operand.vmem [shape: f32[2,1,32], index: 3, kind: input, shape index: {}]   ;;  %s769_s4 = inlined_call_operand.vmem [shape: f32[2,16,1], index: 4, kind: input, shape index: {}]   ;;  %s770_s5 = inlined_call_operand.hbm [shape: bf16[2,16,32], index: 5, kind: output, shape index: {}]  }
   0x1   :  { %12 = vsyncpa [#allocation3 + $0x1], 0  ;;  %s640_s18 = smov 0   ;;  %s642_s19 = smov 0  }
   0x2   :  { %s644_s20 = smov 0   ;;  %s646_s21 = smov 0  }
   0x3 LB: > { %s661_s22 = sadd.s32 4294967295, %s604_s21   ;;  %s469_s23 = sadd.s32 4294967294, %s604_s21   ;;  %s604_s21 = sphi %s646_s21, %s776_s21   ;;  %s600_s20 = sphi %s644_s20, %s775_s20   ;;  %s596_s19 = sphi %s642_s19, %s774_s19   ;;  %s592_s18 = sphi %s640_s18, %s773_s18  }
   0x4   : > { %s665_s24 = sadd.s32 1, %s604_s21   ;;  %s150_s25 = sadd.s32 1, %s600_s20 }
   0x5   : > { %s147_s26 = ssub.s32 %s604_s21, %s665_s24  ;;  %p160_p0 = scmp.ne.s32.totalorder %s600_s20, %s596_s19 }
   0x6   : > { %p148_p1 = scmp.eq.s32.totalorder %s147_s26, 0  ;;  %p161_p2 = scmp.eq.s32.totalorder %s661_s22, 1 }
   0x7   : > { %p166_p3 = scmp.ne.s32.totalorder %s596_s19, %s592_s18  ;;  %p167_p4 = scmp.eq.s32.totalorder %s469_s23, 1 }
   0x8   : > { %s676_s27 = scalar_select %p148_p1, %s600_s20, %s150_s25  }
   0x9   : > { %p678_p5 = por %p161_p2, %p160_p0  ;;  %p682_p6 = por %p167_p4, %p166_p3 }
   0xa   : > { %p472_p7 = scmp.ge.s32.totalorder %s604_s21, 1  ;;  %p216_p8 = scmp.lt.s32.totalorder %s604_s21, 3 }
   0xc   : > { %p217_p9 = pnand %p472_p7, %p216_p8 }
   0xd   : > { %p255_p10 = scmp.lt.s32.totalorder (!%p217_p9), %s661_s22, 1  ;;  %v606_v0 = vmov (!%p217_p9), 0   ;;  %v478_v4 = vld [vmem:[%s766_s1] ss:$0 sm:$0xff] (!%p217_p9)  ;;  %vm306_vm1 = vcmask (!%p217_p9), 261120   ;;  %s252_s16 = sand.u32 (!%p217_p9), 1, %s596_s19  }
   0xe   : > { %220 = sbr.rel (%p217_p9) target bundleno = 239 (0xef), region = 40  ;;  %539 = vset.pattern.permute.xlu0 (!%p217_p9), %v606_v0  ;;  %s473_s26 = sshll.u32 (!%p217_p9), %s252_s16, 3  ;;  %vm360_vm3 = vcmask (!%p217_p9), 257024  }
   0xf   : > { %s607_s15 = smov (!%p217_p9), [#allocation2]  }
  0x10   : > { %s546_s17 = sshll.u32 (!%p217_p9), %s607_s15, 4  ;;  %s547_s17 = int_to_ptr.vmem [resolvable:$false] %s546_s17 }
  0x11   : > { %s548_s23 = scalar_lea.vmem (!%p217_p9), %s547_s17, 256 }
  0x15   : > { %s690_s30 = scalar_select %p255_p10, %s661_s22, 1 }
  0x17   : > { %s489_s6 = sshll.u32 %s690_s30, 4  ;;  %s488_s10 = sshll.u32 %s690_s30, 3 }
  0x18   : > { %s270_s9 = scalar_lea.vmem %s769_s4, %s489_s6  ;;  %s259_s13 = scalar_lea.vmem %s765_s0, %s488_s10 }
  0x19   : > { %v276_v1 = vld [vmem:[%s270_s9] sm:$0xff]  ;;  %v277_v2 = vld [vmem:[%s270_s9 + $0x8] sm:$0xff]  ;;  %s262_s25 = scalar_lea.vmem %s767_s2, %s690_s30  ;;  %s265_s8 = scalar_lea.vmem %s768_s3, %s690_s30 }
  0x1a   : > { %288 = vperm.xlu0 %539, %v276_v1   ;;  %v494_v3 = vld [vmem:[%s259_s13] sm:$0xff]   ;;  %s492_s9 = sshll.u32 %s661_s22, 7  ;;  %s254_s10 = scalar_lea.vmem [#allocation2], %s473_s26 }
  0x1b   : > { %v495_v5 = vunpack.c.l.bf16 %v494_v3  ;;  %v496_v9 = vunpack.c.h.bf16 %v494_v3  ;;  %v479_v43 = vld [vmem:[%s262_s25] ss:$0 sm:$0xff]  ;;  %s377_s11 = sshll.u32 %s254_s10, 4  ;;  %s720_s14 = scalar_lea.hbm %s770_s5, %s492_s9  ;;  %s722_s11 = int_to_ptr.vmem [resolvable:$true] %s377_s11 }
  0x1c   : > { %v480_v46 = vld [vmem:[%s265_s8] ss:$0 sm:$0xff]  ;;  %s724_s22 = scalar_lea.sflag [#allocation3], %s252_s16  ;;  %s542_s30 = scalar_lea.vmem %s722_s11, 128 }
  0x1d   : > { %p543_p11 = scmp.ne.s32.totalorder %s722_s11, %s542_s30  ;;  %p549_p0 = scmp.lt.s32.totalorder %s722_s11, %s547_s17 }
  0x1e   : > { %293 = vperm.xlu0 %539, %v277_v2   ;;  %p550_p1 = scmp.lt.s32.totalorder %s548_s23, %s542_s30 }
  0x1f   : > { %p544_p12 = pnand %p543_p11, %p678_p5 }
  0x20   : > { %p551_p2 = por %p550_p1, %p549_p0 }
  0x21   : > { %p545_p13 = pneg %p544_p12 }
  0x23   : > { %p552_p3 = pnand %p551_p2, %p545_p13 }
  0x99   : > { %v289_v6 = vpop.permute.xlu0 %288 }
  0x9a   : > { %v296_v7 = vmul.f32 %v478_v4, %v289_v6 }
  0x9c   : > { %v298_v8 = vadd.f32 %v495_v5, %v296_v7 }
  0x9d   : > { %v294_v10 = vpop.permute.xlu0 %293 }
  0x9e   : > { %v302_v11 = vmul.f32 0.2, %v298_v8  ;;  %v297_v12 = vmul.f32 %v478_v4, %v294_v10  ;;  %vm300_vm0 = vcmp.ge.f32.partialorder %v298_v8, 0.0 }
  0xa0   : > { %v299_v13 = vadd.f32 %v496_v9, %v297_v12  ;;  %v304_v14 = vsel %vm300_vm0, %v298_v8, %v302_v11 }
  0xa1   : > { %v307_v17 = vsel %vm306_vm1, %v304_v14, 0.0 }
  0xa2   : > { %vm301_vm2 = vcmp.ge.f32.partialorder %v299_v13, 0.0  ;;  %v303_v15 = vmul.f32 0.2, %v299_v13 }
  0xa4   : > { %v305_v16 = vsel %vm301_vm2, %v299_v13, %v303_v15 }
  0xa5   : > { %v308_v18 = vsel %vm306_vm1, %v305_v16, 0.0 }
  0xa6   : > { %v309_v19 = vadd.f32 %v308_v18, %v307_v17 }
  0xa8   : > { %v310_v20 = vrot.slane %v309_v19, 4 }
  0xaa   : > { %v311_v21 = vadd.f32 %v310_v20, %v309_v19 }
  0xac   : > { %v312_v22 = vrot.slane %v311_v21, 2 }
  0xae   : > { %v313_v23 = vadd.f32 %v312_v22, %v311_v21 }
  0xb0   : > { %v314_v24 = vrot.slane %v313_v23, 1 }
  0xb2   : > { %v315_v25 = vadd.f32 %v314_v24, %v313_v23 }
  0xb4   : > { %v317_v26 = vmul.f32 0.0625, %v315_v25 }
  0xb6   : > { %v318_v27 = vsub.f32 %v304_v14, %v317_v26  ;;  %v319_v28 = vsub.f32 %v305_v16, %v317_v26 }
  0xb8   : > { %v320_v29 = vmul.f32 %v318_v27, %v318_v27  ;;  %v321_v30 = vmul.f32 %v319_v28, %v319_v28 }
  0xba   : > { %v322_v31 = vsel %vm306_vm1, %v320_v29, 0.0  ;;  %v323_v32 = vsel %vm306_vm1, %v321_v30, 0.0 }
  0xbb   : > { %v324_v33 = vadd.f32 %v323_v32, %v322_v31 }
  0xbd   : > { %v325_v34 = vrot.slane %v324_v33, 4 }
  0xbf   : > { %v326_v35 = vadd.f32 %v325_v34, %v324_v33 }
  0xc1   : > { %v327_v36 = vrot.slane %v326_v35, 2 }
  0xc3   : > { %v328_v37 = vadd.f32 %v327_v36, %v326_v35 }
  0xc5   : > { %v329_v38 = vrot.slane %v328_v37, 1 }
  0xc7   : > { %v330_v39 = vadd.f32 %v329_v38, %v328_v37 }
  0xc9   : > { %v331_v40 = vmul.f32 0.0625, %v330_v39 }
  0xcb   : > { %v332_v41 = vadd.f32 1e-05, %v331_v40 }
  0xcd   : > { %540 = vrsqrt.f32 %v332_v41 }
  0xd7   : > { %v541_v42 = vpop.eup %540 }
  0xd8   : > { %v334_v44 = vmul.f32 %v541_v42, %v318_v27  ;;  %v335_v45 = vmul.f32 %v541_v42, %v319_v28 }
  0xda   : > { %v342_v47 = vmul.f32 %v479_v43, %v334_v44  ;;  %v343_v48 = vmul.f32 %v479_v43, %v335_v45 }
  0xdc   : > { %v350_v49 = vadd.f32 %v480_v46, %v342_v47  ;;  %v351_v50 = vadd.f32 %v480_v46, %v343_v48 }
  0xde   : > { %v491_v51 = vpack.c.bf16 %v351_v50, %v351_v50  ;;  %v490_v52 = vpack.c.bf16 %v350_v49, %v350_v49 }
  0xe0   : > { %361 = vst.msk [vmem:[%s254_s10] sm:$0xf] %vm360_vm3, %v490_v52  ;;  %362 = vst.msk [vmem:[%s254_s10 + $0x4] sm:$0xf] %vm360_vm3, %v491_v51 }
  0xe1   : > { %555 = shalt.err (!%p552_p3)
}
  0xe2   : > { %s556_s16 = scalar_lea.hbm %s720_s14, 128  ;;  %s560_s6 = scalar_lea.hbm %s770_s5, 256 }
  0xe3   : > { %p557_p4 = scmp.ne.s32.totalorder %s720_s14, %s556_s16  ;;  %p561_p9 = scmp.lt.u32.totalorder %s720_s14, %s770_s5 }
  0xe4   : > { %p562_p10 = scmp.lt.u32.totalorder %s560_s6, %s556_s16  ;;  %p564_p12 = scmp.lt.u32.totalorder %s556_s16, %s720_s14 }
  0xe5   : > { %p558_p7 = pnand %p557_p4, %p678_p5 }
  0xe6   : > { %p563_p11 = por %p562_p10, %p561_p9 }
  0xe7   : > { %p559_p8 = pneg %p558_p7 }
  0xe8   : > { %p565_p13 = por %p564_p12, %p563_p11 }
  0xea   : > { %p566_p0 = pnand %p565_p13, %p559_p8 }
  0xec   : > { %569 = shalt.err (!%p566_p0)
}
  0xed   : > { %s608_s9 = smov 64   ;;  %s609_s10 = smov 4  }
  0xee   : > { %497 = dma.vmem_to_hbm [thread:$0]  (%p678_p5), %s722_s11, 128, %s720_s14, %s724_s22, %s608_s9, %s608_s9, %s609_s10  }
  0xef PF: > { %p503_p1 = scmp.ge.s32.totalorder %s604_s21, 2  ;;  %s392_s12 = sand.u32 1, %s592_s18  }
  0xf0   : > { %s393_s13 = scalar_lea.sflag [#allocation3], %s392_s12 }
  0xf1   : > { %p500_p2 = pnand %p503_p1, %p682_p6 }
  0xf3   : > { %587 = dma.done.wait (!%p500_p2), %s393_s13, 128  }
  0xf4   : > { %589 = vsyncadd (!%p500_p2), %s393_s13, 4294967168  ;;  %p15_p3 = scmp.ge.s32.totalorder %s665_s24, 4   ;;  %s773_s18 = smov %s596_s19 }
  0xf5   : > { %s774_s19 = smov %s600_s20  ;;  %s775_s20 = smov %s676_s27 }
  0xf6   : > { %s776_s21 = smov %s665_s24  ;;  %17 = sbr.rel (!%p15_p3) target bundleno = 3 (0x3), region = 84 }
  0xfd   :  { %398 = vsyncpa [#allocation3], 1 }
  0xfe   :  { %400 = vsyncpa [#allocation3 + $0x1], 1 }

</bundles_post_ra>
